<compile_context>
chip_gen: v7x
topology: tpu7x:2x2x1
jax: 0.10.0
libtpu: 0.0.40
codegen_flags: <defaults>
</compile_context>

<pallas_src>
import functools

import jax
import jax.numpy as jnp
from jax.experimental import pallas as pl
from jax.experimental.pallas import tpu as pltpu

_LANES = 128
# Row quantum: a multiple of the sublane packing for f32(8)/bf16(16)/int8-fp8(32) and of the
# accumulator depth, so every multi-row block shape stays (sublane, lane)-tile aligned.
_ROW_QUANTUM = 64


def _round_up(x, m):
    return ((x + m - 1) // m) * m


def _cdiv(a, b):
    return -(-a // b)


def _vmem_capacity_bytes():
    try:
        return int(getattr(pltpu.get_tpu_info(), "vmem_capacity_bytes", 64 << 20))
    except Exception:
        return 64 << 20  # conservative (v7x)


def _default_num_splits():
    # 2 on chips with two TensorCores per device (v4 / v5p megacore, v7x); 1 elsewhere.
    # A wrong guess only changes performance, never correctness.
    try:
        kind = jax.devices()[0].device_kind.lower()
    except Exception:
        return 1
    if "v4" in kind or "v5p" in kind or "v7" in kind or "7x" in kind:
        return 2
    return 1


def _dunl_loss_kernel(y_ref, h_ref, out_ref, *, distribution, blocks_per_split,
                      valid_rows, mask_rows):
    # Zero this split's accumulator at the start of its reduction sweep.
    @pl.when(pl.program_id(1) == 0)
    def _():
        out_ref[...] = jnp.zeros_like(out_ref)

    y = y_ref[...].astype(jnp.float32)
    h = h_ref[...].astype(jnp.float32)

    if distribution == "gaussian":
        d = y - h
        term = d * d
    elif distribution == "binomial":
        # Numerically stable softplus: log1p(exp(h)) == max(h,0) + log1p(exp(-|h|)).
        # (The literal PyTorch expression overflows to inf for h >~ 88 in f32.)
        # TODO(synk): on v6e/v7x with bf16 inputs the 2 EUP transcendentals/element can become
        # the binding unit; a bf16 softplus (f32 accumulate) would restore the HBM roofline.
        softplus = jnp.maximum(h, 0.0) + jnp.log1p(jnp.exp(-jnp.abs(h)))
        term = -y * h + softplus
    else:  # poisson
        term = -y * h + jnp.exp(h)

    tile_rows, cols = term.shape

    if mask_rows:
        # Partial boundary blocks read unspecified padding rows; zero them after the math.
        # (where() is a select, so inf/nan garbage in the dead branch does not propagate.)
        block_id = pl.program_id(0) * blocks_per_split + pl.program_id(1)
        rid = jax.lax.broadcasted_iota(jnp.int32, term.shape, 0) + block_id * tile_rows
        term = jnp.where(rid < valid_rows, term, 0.0)

    acc_rows = out_ref.shape[0]
    if tile_rows == acc_rows:
        out_ref[...] += term
    else:
        # Reduce the block to an (acc_rows, cols) slab: acc_rows/8 independent vreg
        # accumulators keep the per-step add chains short (ILP) instead of one deep chain.
        out_ref[...] += jnp.sum(term.reshape(tile_rows // acc_rows, acc_rows, cols), axis=0)


def dunl_1d_loss(y, hxa, model_distribution, *, target_step_bytes=16 << 20,
                 num_splits=None, core_parallel_split=False):
    """Pallas implementation of DUNL1DLoss.forward. Returns a scalar float32."""
    if model_distribution not in ("gaussian", "binomial", "poisson"):
        raise ValueError(f"unknown distribution {model_distribution!r}")
    assert y.shape == hxa.shape, (y.shape, hxa.shape)

    total = int(y.size)
    if total == 0:
        return jnp.float32(jnp.nan)

    if num_splits is None:
        num_splits = _default_num_splits()
    num_splits = max(1, int(num_splits))

    vmem_cap = _vmem_capacity_bytes()
    # Per-step combined input byte budget; keep the double-buffered footprint well inside VMEM.
    target = min(int(target_step_bytes), max(1 << 20, (vmem_cap - (20 << 20)) // 2))
    target = max(target, 1)

    item_sum = y.dtype.itemsize + hxa.dtype.itemsize
    last_dim = int(y.shape[-1]) if y.ndim else 1

    # ---- Choose a 2-D (rows, cols) view WITHOUT copying the inputs. -----------------------
    if total % _LANES == 0:
        cols = _LANES                        # lane-dense slab; free (bitcast) reshape
        rows = total // _LANES
        y2 = jnp.reshape(y, (rows, cols))
        h2 = jnp.reshape(hxa, (rows, cols))
    elif last_dim * item_sum * _ROW_QUANTUM * 2 <= max(vmem_cap - (20 << 20), 1 << 20):
        cols = last_dim                      # ragged tail: full last dim as the lane axis
        rows = total // last_dim
        y2 = jnp.reshape(y, (rows, cols))
        h2 = jnp.reshape(hxa, (rows, cols))
    else:
        # Rare fallback (huge non-128-multiple last dim): pad the flat view to a multiple of
        # 128 with loss-neutral values (<=127 pad elements; costs one HBM copy).
        pad = (-total) % _LANES
        h_pad = 0.0 if model_distribution == "gaussian" else -1e4
        yf = jnp.pad(jnp.reshape(y, (-1,)), (0, pad))
        hf = jnp.pad(jnp.reshape(hxa, (-1,)), (0, pad), constant_values=h_pad)
        cols = _LANES
        rows = (total + pad) // _LANES
        y2 = jnp.reshape(yf, (rows, cols))
        h2 = jnp.reshape(hf, (rows, cols))

    # ---- Tile sizing by byte budget. -------------------------------------------------------
    bytes_per_row = cols * item_sum
    budget_rows = max(_ROW_QUANTUM, (target // bytes_per_row) // _ROW_QUANTUM * _ROW_QUANTUM)

    if rows <= budget_rows:
        tile_rows = rows                    # single full-extent block (legal for any row count)
        splits = 1
    else:
        splits = num_splits
        tile_rows = min(budget_rows, _round_up(_cdiv(rows, splits), _ROW_QUANTUM))

    n_blocks = _cdiv(rows, tile_rows)
    blocks_per_split = _cdiv(n_blocks, splits)
    coverage = splits * blocks_per_split * tile_rows
    mask_rows = coverage != rows
    acc_rows = _ROW_QUANTUM if tile_rows % _ROW_QUANTUM == 0 else tile_rows

    if splits * blocks_per_split > n_blocks:
        # Trailing grid steps of an over-covering grid: clamp the DMA source to the last real
        # block (the in-kernel row mask zeroes their contribution).
        def in_map(c, i, _bps=blocks_per_split, _last=n_blocks - 1):
            return (jnp.minimum(c * _bps + i, _last), 0)
    else:
        def in_map(c, i, _bps=blocks_per_split):
            return (c * _bps + i, 0)

    step_bytes = tile_rows * bytes_per_row
    out_bytes = acc_rows * cols * 4
    vmem_limit = 2 * step_bytes + 4 * out_bytes + (4 << 20)
    vmem_limit = int(max(min(vmem_limit, vmem_cap - (8 << 20)), 8 << 20))

    if core_parallel_split and splits > 1:
        # Explicitly shard the leading (split) axis across TensorCores (v7x / megacore chips).
        semantics = (pltpu.CORE_PARALLEL, pltpu.ARBITRARY)
    else:
        semantics = ("parallel", "arbitrary")

    kernel = functools.partial(
        _dunl_loss_kernel,
        distribution=model_distribution,
        blocks_per_split=blocks_per_split,
        valid_rows=rows,
        mask_rows=mask_rows,
    )

    partial_sums = pl.pallas_call(
        kernel,
        out_shape=jax.ShapeDtypeStruct((splits, acc_rows, cols), jnp.float32),
        grid_spec=pltpu.PrefetchScalarGridSpec(
            num_scalar_prefetch=0,
            grid=(splits, blocks_per_split),
            in_specs=[
                pl.BlockSpec((tile_rows, cols), in_map),
                pl.BlockSpec((tile_rows, cols), in_map),
            ],
            out_specs=pl.BlockSpec((None, acc_rows, cols), lambda c, i: (c, 0, 0)),
        ),
        compiler_params=pltpu.CompilerParams(
            dimension_semantics=semantics,
            vmem_limit_bytes=vmem_limit,
        ),
    )(y2, h2)

    return jnp.sum(partial_sums) / jnp.float32(total)


def _reference(y, hxa, model_distribution):
    yf = y.astype(jnp.float32)
    h = hxa.astype(jnp.float32)
    if model_distribution == "gaussian":
        loss = (yf - h) ** 2
    elif model_distribution == "binomial":
        sp = jnp.maximum(h, 0.0) + jnp.log1p(jnp.exp(-jnp.abs(h)))  # stable softplus
        loss = -jnp.mean(yf * h, axis=-1) + jnp.mean(sp, axis=-1)
    else:
        loss = -jnp.mean(yf * h, axis=-1) + jnp.mean(jnp.exp(h), axis=-1)
    return jnp.mean(loss)


if __name__ == "__main__":
    key = jax.random.PRNGKey(0)
    k = jax.random.split(key, 8)

    y_a = jax.random.normal(k[0], (2, 4, 128), dtype=jnp.float32)   # lane-aligned
    h_a = 0.5 * jax.random.normal(k[1], (2, 4, 128), dtype=jnp.float32)
    y_b = jax.random.normal(k[2], (3, 4, 100), dtype=jnp.float32)   # ragged last dim
    h_b = 0.5 * jax.random.normal(k[3], (3, 4, 100), dtype=jnp.float32)
    y_c = jax.random.normal(k[4], (16, 9, 128), dtype=jnp.float32)  # 144 rows of 128
    h_c = 0.5 * jax.random.normal(k[5], (16, 9, 128), dtype=jnp.float32)
    y_d = jax.random.normal(k[6], (40, 5, 100), dtype=jnp.float32)  # 200 rows of 100
    h_d = 0.5 * jax.random.normal(k[7], (40, 5, 100), dtype=jnp.float32)
    y_bf = y_a.astype(jnp.bfloat16)
    h_bf = h_a.astype(jnp.bfloat16)

    checks = []
    # Default path: lane-aligned flatten and ragged-last-dim views, all distributions.
    for (yy, hh) in ((y_a, h_a), (y_b, h_b)):
        for dist in ("gaussian", "binomial", "poisson"):
            checks.append((dist, yy, hh, {}))
    # bf16 inputs (native-dtype DMA, in-kernel cast to f32).
    checks.append(("gaussian", y_bf, h_bf, {}))
    # Tiny tiles: multi-block sweep + boundary-row masking (lane-aligned).
    checks.append(("poisson", y_c, h_c, dict(target_step_bytes=1 << 13, num_splits=1)))
    # Two-way split with an over-covering grid -> clamped index map (correct even on 1 TC).
    checks.append(("gaussian", y_c, h_c, dict(target_step_bytes=1 << 13, num_splits=2)))
    # Multi-quantum tile -> in-kernel partial-reduce path (tile_rows > acc_rows), lane-aligned.
    checks.append(("gaussian", y_c, h_c, dict(target_step_bytes=128 << 10, num_splits=1)))
    # Ragged last dim with multi-block sweep, masking, and the partial-reduce path.
    checks.append(("poisson", y_d, h_d, dict(target_step_bytes=100 << 10, num_splits=1)))

    ok = True
    for dist, yy, hh, kwargs in checks:
        got = jax.block_until_ready(dunl_1d_loss(yy, hh, dist, **kwargs))
        want = jax.block_until_ready(_reference(yy, hh, dist))
        if not jnp.allclose(got, want, rtol=1e-5, atol=1e-5):
            ok = False
            print(f"MISMATCH {dist} shape={yy.shape} dtype={yy.dtype} {kwargs}: "
                  f"got {got}, want {want}")

    if ok:
        print("KERNEL_OK")
</pallas_src>

<mosaic_0001>
module attributes {stable_mosaic.version = 11 : i64} {
  func.func @_dunl_loss_kernel(%arg0: i32, %arg1: i32, %arg2: memref<8x128xf32, #tpu.memory_space<vmem>>, %arg3: memref<8x128xf32, #tpu.memory_space<vmem>>, %arg4: memref<1x8x128xf32, #tpu.memory_space<vmem>>) attributes {dimension_semantics = [#tpu.dimension_semantics<parallel>, #tpu.dimension_semantics<arbitrary>], iteration_bounds = array<i64: 1, 1>, scalar_prefetch = 0 : i64, scratch_operands = 0 : i64, tpu.core_type = #tpu.core_type<tc>, window_params = [{transform_indices = @transform_0, window_bounds = array<i64: 8, 128>}, {transform_indices = @transform_1, window_bounds = array<i64: 8, 128>}, {transform_indices = @transform_2, window_bounds = array<i64: 1, 8, 128>}]} {
    %c0_i32 = arith.constant 0 : i32
    %0 = arith.cmpi eq, %arg1, %c0_i32 : i32
    %1 = arith.extui %0 : i1 to i32
    %c0_i32_0 = arith.constant 0 : i32
    %2 = arith.cmpi ne, %1, %c0_i32_0 : i32
    scf.if %2 {
      %cst = arith.constant 0.000000e+00 : f32
      %13 = vector.broadcast %cst : f32 to vector<8x128xf32>
      %c0_10 = arith.constant 0 : index
      %c0_11 = arith.constant 0 : index
      %c0_12 = arith.constant 0 : index
      %14 = vector.load %arg4[%c0_10, %c0_11, %c0_12] : memref<1x8x128xf32, #tpu.memory_space<vmem>>, vector<1x8x128xf32>
      %15 = vector.shape_cast %14 : vector<1x8x128xf32> to vector<8x128xf32>
      %16 = vector.shape_cast %13 : vector<8x128xf32> to vector<1x8x128xf32>
      tpu.vector_store %arg4[%c0_10, %c0_11, %c0_12], %16 {strides = array<i32>} : memref<1x8x128xf32, #tpu.memory_space<vmem>>, vector<1x8x128xf32>,
    } else {
    }
    %c0 = arith.constant 0 : index
    %c0_1 = arith.constant 0 : index
    %3 = vector.load %arg2[%c0, %c0_1] : memref<8x128xf32, #tpu.memory_space<vmem>>, vector<8x128xf32>
    %c0_2 = arith.constant 0 : index
    %c0_3 = arith.constant 0 : index
    %4 = vector.load %arg3[%c0_2, %c0_3] : memref<8x128xf32, #tpu.memory_space<vmem>>, vector<8x128xf32>
    %5 = arith.subf %3, %4 : vector<8x128xf32>
    %6 = arith.mulf %5, %5 : vector<8x128xf32>
    %c0_4 = arith.constant 0 : index
    %c0_5 = arith.constant 0 : index
    %c0_6 = arith.constant 0 : index
    %7 = vector.load %arg4[%c0_4, %c0_5, %c0_6] : memref<1x8x128xf32, #tpu.memory_space<vmem>>, vector<1x8x128xf32>
    %8 = vector.shape_cast %7 : vector<1x8x128xf32> to vector<8x128xf32>
    %9 = arith.addf %8, %6 : vector<8x128xf32>
    %c0_7 = arith.constant 0 : index
    %c0_8 = arith.constant 0 : index
    %c0_9 = arith.constant 0 : index
    %10 = vector.load %arg4[%c0_7, %c0_8, %c0_9] : memref<1x8x128xf32, #tpu.memory_space<vmem>>, vector<1x8x128xf32>
    %11 = vector.shape_cast %10 : vector<1x8x128xf32> to vector<8x128xf32>
    %12 = vector.shape_cast %9 : vector<8x128xf32> to vector<1x8x128xf32>
    tpu.vector_store %arg4[%c0_7, %c0_8, %c0_9], %12 {strides = array<i32>} : memref<1x8x128xf32, #tpu.memory_space<vmem>>, vector<1x8x128xf32>,
    return
  }
  func.func @transform_0(%arg0: i32, %arg1: i32) -> (i32, i32) {
    %c1_i32 = arith.constant 1 : i32
    %0 = arith.muli %arg0, %c1_i32 : i32
    %1 = arith.addi %0, %arg1 : i32
    %c0_i32 = arith.constant 0 : i32
    %c0_i32_0 = arith.constant 0 : i32
    return %1, %c0_i32 : i32, i32
  }
  func.func @transform_1(%arg0: i32, %arg1: i32) -> (i32, i32) {
    %c1_i32 = arith.constant 1 : i32
    %0 = arith.muli %arg0, %c1_i32 : i32
    %1 = arith.addi %0, %arg1 : i32
    %c0_i32 = arith.constant 0 : i32
    %c0_i32_0 = arith.constant 0 : i32
    return %1, %c0_i32 : i32, i32
  }
  func.func @transform_2(%arg0: i32, %arg1: i32) -> (i32, i32, i32) {
    %c0_i32 = arith.constant 0 : i32
    %c0_i32_0 = arith.constant 0 : i32
    %c0_i32_1 = arith.constant 0 : i32
    return %arg0, %c0_i32, %c0_i32_0 : i32, i32, i32
  }
}

</mosaic_0001>

<bundles_post_ra>
// kernel: tpu_custom_call.1
= control target key start
LH: loop header
LB: loop body
LE: loop exit
PB: predicated region body
PF: predicated region fallthrough
CT: control target
= control target key end

     0   :  { %7 = vsyncpa [#allocation3], 0  ;;  %s202_s0 = inlined_call_operand.hbm [shape: f32[8,128], index: 0, kind: input, shape index: {}]   ;;  %s203_s1 = inlined_call_operand.hbm [shape: f32[8,128], index: 1, kind: input, shape index: {}]   ;;  %s204_s2 = inlined_call_operand.hbm [shape: f32[1,8,128], index: 2, kind: output, shape index: {}]  }
   0x1   :  { %8 = vsyncpa [#allocation6], 0 }
   0x2   :  { %9 = vsyncpa [#allocation4], 0  ;;  %s148_s9 = smov [#allocation2]   ;;  %s149_s11 = smov [#allocation5]  }
   0x3   :  { %s19_s10 = sshll.u32 %s148_s9, 4  ;;  %s32_s12 = sshll.u32 %s149_s11, 4  ;;  %s20_s10 = int_to_ptr.vmem [resolvable:$true] %s19_s10  ;;  %s33_s12 = int_to_ptr.vmem [resolvable:$true] %s32_s12 }
   0x4   :  { %s76_s15 = scalar_lea.hbm %s202_s0, 128 }
   0x5   :  { %p77_p0 = scmp.ne.s32.totalorder %s202_s0, %s76_s15  ;;  %p80_p1 = scmp.lt.u32.totalorder %s76_s15, %s202_s0 }
   0x7   :  { %p82_p2 = pnand %p80_p1, %p77_p0 }
   0x9   :  { %85 = shalt.err (!%p82_p2)
}
   0xa   :  { %s86_s20 = scalar_lea.vmem %s20_s10, 128  ;;  %p91_p4 = scmp.lt.s32.totalorder %s20_s10, %s20_s10 }
   0xb   :  { %p87_p3 = scmp.ne.s32.totalorder %s20_s10, %s86_s20  ;;  %p92_p5 = scmp.lt.s32.totalorder %s86_s20, %s86_s20 }
   0xd   :  { %p93_p6 = por %p92_p5, %p91_p4 }
   0xf   :  { %p94_p7 = pnand %p93_p6, %p87_p3 }
  0x11   :  { %97 = shalt.err (!%p94_p7)
}
  0x12   :  { %22 = dma.hbm_to_vmem [thread:$0]  %s202_s0, 128, %s20_s10, [#allocation3]  }
  0x13   :  { %s98_s25 = scalar_lea.hbm %s203_s1, 128 }
  0x14   :  { %p99_p8 = scmp.ne.s32.totalorder %s203_s1, %s98_s25  ;;  %p102_p9 = scmp.lt.u32.totalorder %s98_s25, %s203_s1 }
  0x16   :  { %p104_p10 = pnand %p102_p9, %p99_p8 }
  0x18   :  { %107 = shalt.err (!%p104_p10)
}
  0x19   :  { %s108_s30 = scalar_lea.vmem %s33_s12, 128  ;;  %p113_p12 = scmp.lt.s32.totalorder %s33_s12, %s33_s12 }
  0x1a   :  { %p109_p11 = scmp.ne.s32.totalorder %s33_s12, %s108_s30  ;;  %p114_p13 = scmp.lt.s32.totalorder %s108_s30, %s108_s30 }
  0x1c   :  { %p115_p0 = por %p114_p13, %p113_p12 }
  0x1e   :  { %p116_p1 = pnand %p115_p0, %p109_p11 }
  0x20   :  { %119 = shalt.err (!%p116_p1)
}
  0x21   :  { %35 = dma.hbm_to_vmem [thread:$0]  %s203_s1, 128, %s33_s12, [#allocation6]  }
  0x22   :  { %142 = dma.done.wait [#allocation3], 128  }
  0x23   :  { %143 = vsyncadd [#allocation3], 4294967168 }
  0x24   :  { %144 = dma.done.wait [#allocation6], 128  }
  0x25   :  { %145 = vsyncadd [#allocation6], 4294967168  ;;  %v49_v0 = vld [vmem:[#allocation2] sm:$0xff]  ;;  %v50_v1 = vld [vmem:[#allocation5] sm:$0xff]  ;;  %s150_s4 = smov [#allocation7]  }
  0x26   :  { %v51_v2 = vsub.f32 %v49_v0, %v50_v1  ;;  %s62_s5 = sshll.u32 %s150_s4, 4  ;;  %s63_s5 = int_to_ptr.vmem [resolvable:$true] %s62_s5 }
  0x27   :  { %s120_s6 = scalar_lea.vmem %s63_s5, 128  ;;  %p125_p3 = scmp.lt.s32.totalorder %s63_s5, %s63_s5 }
  0x28   :  { %v52_v3 = vmul.f32 %v51_v2, %v51_v2  ;;  %p121_p2 = scmp.ne.s32.totalorder %s63_s5, %s120_s6  ;;  %p126_p4 = scmp.lt.s32.totalorder %s120_s6, %s120_s6 }
  0x2a   :  { %55 = vst [vmem:[#allocation7] sm:$0xff] %v52_v3  ;;  %p127_p5 = por %p126_p4, %p125_p3 }
  0x2c   :  { %p128_p6 = pnand %p127_p5, %p121_p2 }
  0x2e   :  { %131 = shalt.err (!%p128_p6)
}
  0x2f   :  { %s132_s8 = scalar_lea.hbm %s204_s2, 128 }
  0x30   :  { %p133_p7 = scmp.ne.s32.totalorder %s204_s2, %s132_s8  ;;  %p136_p8 = scmp.lt.u32.totalorder %s132_s8, %s204_s2 }
  0x32   :  { %p138_p9 = pnand %p136_p8, %p133_p7 }
  0x34   :  { %141 = shalt.err (!%p138_p9)
}
  0x35   :  { %65 = dma.vmem_to_hbm [thread:$0]  %s63_s5, 128, %s204_s2, [#allocation4]  }
  0x36   :  { %146 = dma.done.wait [#allocation4], 128  }
  0x37   :  { %147 = vsyncadd [#allocation4], 4294967168 }
  0x38   :  { %69 = vsyncpa [#allocation3], 1 }
  0x39   :  { %70 = vsyncpa [#allocation6], 1 }
  0x3a   :  { %71 = vsyncpa [#allocation4], 1 }

</bundles_post_ra>
